<compile_context>
chip_gen: v5e
topology: v5e:2x2
jax: 0.10.0
libtpu: 0.0.40
codegen_flags: <defaults>
</compile_context>

<pallas_src>
import jax
import jax.numpy as jnp
from jax import lax
from jax.experimental import pallas as pl
from jax.experimental.pallas import tpu as pltpu

KSIZE = 3                        # kernel_size=3, padding=1 (same-shape conv)
MXU_MIN_CIN = 64                 # below this the 1x1 conv runs on the VPU
VMEM_BUDGET = 12 * 1024 * 1024   # per-step working-set target (headroom on v7x 64MiB)


def _dsconv_kernel(x_ref, xp_ref, xn_ref, wd_ref, wp_ref, o_ref, xpad_ref):
    # x_ref   : (1, Cin, TH, W)      current row-block (NCHW)
    # xp_ref  : (1, Cin, HR, W)      8-row block containing the row just above (halo)
    # xn_ref  : (1, Cin, HR, W)      8-row block containing the row just below (halo)
    # wd_ref  : (9, Cin, 1, 1)       depthwise taps, tap k = kh*3 + kw
    # wp_ref  : (Cin, Cout, 1, 1)    pointwise weights (VPU path) or (Cout, Cin) (MXU path)
    # o_ref   : (1, Cout, TH, W)
    # xpad_ref: (Cin, TH+2, W+2)     scratch in the input dtype: padded tile
    Cin, TH, W = x_ref.shape[1], x_ref.shape[2], x_ref.shape[3]
    Cout = o_ref.shape[1]
    HR = xp_ref.shape[2]

    h = pl.program_id(1)
    is_first = h == 0
    is_last = h == pl.num_programs(1) - 1

    # ---- Assemble the zero-padded tile in VMEM (fuses the conv's padding=1). ----
    # Only the border strictly needs zeroing; full fill keeps it simple & cheap.
    xpad_ref[...] = jnp.zeros_like(xpad_ref)
    xpad_ref[:, 1:TH + 1, 1:W + 1] = x_ref[0]
    top = xp_ref[0, :, HR - 1:HR, :]                       # image row above block
    bot = xn_ref[0, :, 0:1, :]                             # image row below block
    xpad_ref[:, 0:1, 1:W + 1] = jnp.where(is_first, jnp.zeros_like(top), top)
    xpad_ref[:, TH + 1:TH + 2, 1:W + 1] = jnp.where(is_last, jnp.zeros_like(bot), bot)

    # ---- Depthwise 3x3: 9 shifted windows * per-channel tap (VPU, f32 acc). ----
    wd = wd_ref[...].astype(jnp.float32)                   # hoisted: load taps once
    acc = jnp.zeros((Cin, TH, W), jnp.float32)
    for kh in range(KSIZE):
        for kw in range(KSIZE):
            # lazy window read from the scratch (no full-tile f32 copy up front)
            win = xpad_ref[:, kh:kh + TH, kw:kw + W].astype(jnp.float32)
            acc = acc + win * wd[kh * KSIZE + kw]          # (Cin,1,1) bcast over (TH,W)

    # ---- Pointwise 1x1 conv. ----
    if wp_ref.ndim == 4:
        # Small-Cin regime: a (TH*W, Cin) x (Cin, Cout) matmul would waste the MXU;
        # do Cout broadcast-multiply-accumulates on the VPU instead.
        wp = wp_ref[...].astype(jnp.float32)               # (Cin, Cout, 1, 1)
        out = jnp.zeros((Cout, TH, W), jnp.float32)
        for ci in range(Cin):
            out = out + acc[ci:ci + 1] * wp[ci]            # (1,TH,W) * (Cout,1,1)
    else:
        # Large-Cin regime: contraction over Cin is big enough for the MXU.
        wp = wp_ref[...].astype(jnp.float32)               # (Cout, Cin)
        out = jnp.dot(wp, acc.reshape(Cin, TH * W),
                      preferred_element_type=jnp.float32).reshape(Cout, TH, W)

    # Lane-dense store: W on the lane axis (NCHW output, no wrapper transpose).
    o_ref[0] = out.astype(o_ref.dtype)


def _choose_tile_h(H, W, Cin, Cout, in_bytes, out_bytes):
    """Largest row-tile TH (multiple of 8 dividing H) whose double-buffered
    working set fits the VMEM budget; prefers >= 2 row blocks so the grid has
    pipeline depth and can split across v7x's two TensorCores."""
    if H % 8 != 0:
        return H                          # odd/tiny H: one block equal to full dim

    def est(th):
        main = Cin * th * W * in_bytes
        halo = 2 * Cin * 8 * W * in_bytes
        outb = Cout * th * W * out_bytes
        scratch = Cin * (th + 2) * (W + 2) * in_bytes
        return 2 * (main + halo + outb) + scratch          # x2: double buffering

    cap = max(8, (H // 2) // 8 * 8)       # keep at least 2 row blocks when H >= 16
    best = 8
    th = 8
    while th <= cap:
        if H % th == 0 and est(th) <= VMEM_BUDGET:
            best = th
        th += 8
    return best


def depthwise_separable_conv(x_nchw, w_depth, w_point):
    """Forward pass matching the PyTorch module.

    x_nchw : (N, Cin, H, W)
    w_depth: (Cin, 1, 3, 3)    -- nn.Conv2d(groups=Cin, bias=False).weight
    w_point: (Cout, Cin, 1, 1) -- nn.Conv2d(k=1, bias=False).weight
    returns: (N, Cout, H, W)
    """
    N, Cin, H, W = x_nchw.shape
    Cout = w_point.shape[0]

    in_bytes = jnp.dtype(x_nchw.dtype).itemsize
    TH = _choose_tile_h(H, W, Cin, Cout, in_bytes, in_bytes)
    HR = 8 if H % 8 == 0 else H           # halo-block rows (min legal sublane tile)
    nH = H // TH
    th_blocks = TH // HR                  # main-tile size measured in HR-row blocks
    n_hr_blocks = H // HR

    # Depthwise taps as (9, Cin, 1, 1): tap k broadcasts per-channel over (TH, W).
    wd9 = jnp.transpose(w_depth[:, 0, :, :], (1, 2, 0)).reshape(
        KSIZE * KSIZE, Cin, 1, 1)

    if Cin < MXU_MIN_CIN:
        # Small-channel regime (this module's use case): VPU pointwise.
        wp_arr = jnp.transpose(w_point[:, :, 0, 0], (1, 0)).reshape(Cin, Cout, 1, 1)
        wp_spec = pl.BlockSpec((Cin, Cout, 1, 1), lambda n, h: (0, 0, 0, 0))
    else:
        # Large-channel regime: dense (Cout, Cin) weights for the MXU path.
        wp_arr = w_point[:, :, 0, 0]
        wp_spec = pl.BlockSpec((Cout, Cin), lambda n, h: (0, 0))

    # The input is passed three times: the main row-block plus two cheap 8-row
    # blocks carrying the one-row halo above/below (block index clamped at the
    # image edge; the kernel masks those contributions to zero).
    x_main_spec = pl.BlockSpec((1, Cin, TH, W), lambda n, h: (n, 0, h, 0))
    x_prev_spec = pl.BlockSpec(
        (1, Cin, HR, W),
        lambda n, h: (n, 0, jnp.maximum(h * th_blocks - 1, 0), 0))
    x_next_spec = pl.BlockSpec(
        (1, Cin, HR, W),
        lambda n, h: (n, 0, jnp.minimum((h + 1) * th_blocks, n_hr_blocks - 1), 0))

    out = pl.pallas_call(
        _dsconv_kernel,
        out_shape=jax.ShapeDtypeStruct((N, Cout, H, W), x_nchw.dtype),
        grid_spec=pltpu.PrefetchScalarGridSpec(
            num_scalar_prefetch=0,
            grid=(N, nH),
            in_specs=[
                x_main_spec,
                x_prev_spec,
                x_next_spec,
                pl.BlockSpec((KSIZE * KSIZE, Cin, 1, 1),
                             lambda n, h: (0, 0, 0, 0)),
                wp_spec,
            ],
            out_specs=pl.BlockSpec((1, Cout, TH, W), lambda n, h: (n, 0, h, 0)),
            scratch_shapes=[pltpu.VMEM((Cin, TH + 2, W + 2), x_nchw.dtype)],
        ),
        compiler_params=pltpu.CompilerParams(
            dimension_semantics=("parallel", "parallel"),
            vmem_limit_bytes=32 * 1024 * 1024),
    )(x_nchw, x_nchw, x_nchw, wd9, wp_arr)
    return out


def _reference(x_nchw, w_depth, w_point):
    """Pure-JAX reference (lax.conv) for correctness checking."""
    Cin = x_nchw.shape[1]
    dn = lax.conv_dimension_numbers(x_nchw.shape, w_depth.shape,
                                    ("NCHW", "OIHW", "NCHW"))
    dw = lax.conv_general_dilated(
        x_nchw, w_depth, window_strides=(1, 1), padding=((1, 1), (1, 1)),
        dimension_numbers=dn, feature_group_count=Cin)
    dn2 = lax.conv_dimension_numbers(dw.shape, w_point.shape,
                                     ("NCHW", "OIHW", "NCHW"))
    return lax.conv_general_dilated(
        dw, w_point, window_strides=(1, 1), padding=((0, 0), (0, 0)),
        dimension_numbers=dn2)


if __name__ == "__main__":
    key = jax.random.PRNGKey(0)
    kx, kd, kp = jax.random.split(key, 3)

    N, Cin, Cout, H, W = 2, 4, 8, 16, 16

    x = jax.random.normal(kx, (N, Cin, H, W), dtype=jnp.float32)
    # Deterministic synthetic weights (shapes match the nn.Conv2d weights).
    w_depth = jax.random.normal(kd, (Cin, 1, KSIZE, KSIZE), dtype=jnp.float32) * 0.1
    w_point = jax.random.normal(kp, (Cout, Cin, 1, 1), dtype=jnp.float32) * 0.1

    out = jax.block_until_ready(depthwise_separable_conv(x, w_depth, w_point))
    ref = jax.block_until_ready(_reference(x, w_depth, w_point))

    assert out.shape == (N, Cout, H, W)
    assert jnp.allclose(out, ref, atol=1e-4, rtol=1e-4)

    print("KERNEL_OK")
</pallas_src>

<mosaic_0001>
module attributes {stable_mosaic.version = 11 : i64} {
  func.func @_dsconv_kernel(%arg0: i32, %arg1: i32, %arg2: memref<1x4x8x16xf32, #tpu.memory_space<vmem>>, %arg3: memref<1x4x8x16xf32, #tpu.memory_space<vmem>>, %arg4: memref<1x4x8x16xf32, #tpu.memory_space<vmem>>, %arg5: memref<9x4x1x1xf32, #tpu.memory_space<vmem>>, %arg6: memref<4x8x1x1xf32, #tpu.memory_space<vmem>>, %arg7: memref<1x8x8x16xf32, #tpu.memory_space<vmem>>, %arg8: memref<4x10x18xf32, #tpu.memory_space<vmem>>) attributes {dimension_semantics = [#tpu.dimension_semantics<parallel>, #tpu.dimension_semantics<parallel>], iteration_bounds = array<i64: 2, 2>, scalar_prefetch = 0 : i64, scratch_operands = 1 : i64, tpu.core_type = #tpu.core_type<tc>, window_params = [{transform_indices = @transform_0, window_bounds = array<i64: 1, 4, 8, 16>}, {transform_indices = @transform_1, window_bounds = array<i64: 1, 4, 8, 16>}, {transform_indices = @transform_2, window_bounds = array<i64: 1, 4, 8, 16>}, {pipeline_mode = #tpu.pipeline_mode<synchronous>, transform_indices = @transform_3, window_bounds = array<i64: 9, 4, 1, 1>}, {pipeline_mode = #tpu.pipeline_mode<synchronous>, transform_indices = @transform_4, window_bounds = array<i64: 4, 8, 1, 1>}, {transform_indices = @transform_5, window_bounds = array<i64: 1, 8, 8, 16>}]} {
    %c0_i32 = arith.constant 0 : i32
    %0 = arith.cmpi eq, %arg1, %c0_i32 : i32
    %c1_i32 = arith.constant 1 : i32
    %1 = arith.cmpi eq, %arg1, %c1_i32 : i32
    %cst = arith.constant 0.000000e+00 : f32
    %2 = vector.broadcast %cst : f32 to vector<4x10x18xf32>
    %c0 = arith.constant 0 : index
    %c0_0 = arith.constant 0 : index
    %c0_1 = arith.constant 0 : index
    %3 = vector.load %arg8[%c0, %c0_0, %c0_1] : memref<4x10x18xf32, #tpu.memory_space<vmem>>, vector<4x10x18xf32>
    tpu.vector_store %arg8[%c0, %c0_0, %c0_1], %2 {strides = array<i32>} : memref<4x10x18xf32, #tpu.memory_space<vmem>>, vector<4x10x18xf32>,
    %c0_2 = arith.constant 0 : index
    %c0_3 = arith.constant 0 : index
    %c0_4 = arith.constant 0 : index
    %c0_5 = arith.constant 0 : index
    %4 = vector.load %arg2[%c0_2, %c0_3, %c0_4, %c0_5] : memref<1x4x8x16xf32, #tpu.memory_space<vmem>>, vector<1x4x8x16xf32>
    %5 = vector.shape_cast %4 : vector<1x4x8x16xf32> to vector<4x8x16xf32>
    %c0_6 = arith.constant 0 : index
    %c1 = arith.constant 1 : index
    %c1_7 = arith.constant 1 : index
    %6 = vector.load %arg8[%c0_6, %c1, %c1_7] : memref<4x10x18xf32, #tpu.memory_space<vmem>>, vector<4x8x16xf32>
    tpu.vector_store %arg8[%c0_6, %c1, %c1_7], %5 {strides = array<i32>} : memref<4x10x18xf32, #tpu.memory_space<vmem>>, vector<4x8x16xf32>,
    %c0_8 = arith.constant 0 : index
    %c0_9 = arith.constant 0 : index
    %c7 = arith.constant 7 : index
    %c0_10 = arith.constant 0 : index
    %7 = vector.load %arg3[%c0_8, %c0_9, %c7, %c0_10] : memref<1x4x8x16xf32, #tpu.memory_space<vmem>>, vector<1x4x1x16xf32>
    %8 = vector.shape_cast %7 : vector<1x4x1x16xf32> to vector<4x1x16xf32>
    %c0_11 = arith.constant 0 : index
    %c0_12 = arith.constant 0 : index
    %c0_13 = arith.constant 0 : index
    %c0_14 = arith.constant 0 : index
    %9 = vector.load %arg4[%c0_11, %c0_12, %c0_13, %c0_14] : memref<1x4x8x16xf32, #tpu.memory_space<vmem>>, vector<1x4x1x16xf32>
    %10 = vector.shape_cast %9 : vector<1x4x1x16xf32> to vector<4x1x16xf32>
    %cst_15 = arith.constant 0.000000e+00 : f32
    %11 = vector.broadcast %cst_15 : f32 to vector<4x1x16xf32>
    %12 = arith.select %0, %11, %8 : vector<4x1x16xf32>
    %c0_16 = arith.constant 0 : index
    %c0_17 = arith.constant 0 : index
    %c1_18 = arith.constant 1 : index
    %13 = vector.load %arg8[%c0_16, %c0_17, %c1_18] : memref<4x10x18xf32, #tpu.memory_space<vmem>>, vector<4x1x16xf32>
    tpu.vector_store %arg8[%c0_16, %c0_17, %c1_18], %12 {strides = array<i32>} : memref<4x10x18xf32, #tpu.memory_space<vmem>>, vector<4x1x16xf32>,
    %cst_19 = arith.constant 0.000000e+00 : f32
    %14 = vector.broadcast %cst_19 : f32 to vector<4x1x16xf32>
    %15 = arith.select %1, %14, %10 : vector<4x1x16xf32>
    %c0_20 = arith.constant 0 : index
    %c9 = arith.constant 9 : index
    %c1_21 = arith.constant 1 : index
    %16 = vector.load %arg8[%c0_20, %c9, %c1_21] : memref<4x10x18xf32, #tpu.memory_space<vmem>>, vector<4x1x16xf32>
    tpu.vector_store %arg8[%c0_20, %c9, %c1_21], %15 {strides = array<i32>} : memref<4x10x18xf32, #tpu.memory_space<vmem>>, vector<4x1x16xf32>,
    %c0_22 = arith.constant 0 : index
    %c0_23 = arith.constant 0 : index
    %c0_24 = arith.constant 0 : index
    %c0_25 = arith.constant 0 : index
    %17 = vector.load %arg5[%c0_22, %c0_23, %c0_24, %c0_25] : memref<9x4x1x1xf32, #tpu.memory_space<vmem>>, vector<9x4x1x1xf32>
    %cst_26 = arith.constant 0.000000e+00 : f32
    %18 = vector.broadcast %cst_26 : f32 to vector<4x8x16xf32>
    %c0_27 = arith.constant 0 : index
    %c0_28 = arith.constant 0 : index
    %c0_29 = arith.constant 0 : index
    %19 = vector.load %arg8[%c0_27, %c0_28, %c0_29] : memref<4x10x18xf32, #tpu.memory_space<vmem>>, vector<4x8x16xf32>
    %20 = vector.extract_strided_slice %17 {offsets = [0, 0, 0, 0], sizes = [1, 4, 1, 1], strides = [1, 1, 1, 1]} : vector<9x4x1x1xf32> to vector<1x4x1x1xf32>
    %21 = vector.shape_cast %20 : vector<1x4x1x1xf32> to vector<4x1x1xf32>
    %22 = vector.broadcast %21 : vector<4x1x1xf32> to vector<4x8x16xf32>
    %23 = arith.mulf %19, %22 : vector<4x8x16xf32>
    %24 = arith.addf %18, %23 : vector<4x8x16xf32>
    %c0_30 = arith.constant 0 : index
    %c0_31 = arith.constant 0 : index
    %c1_32 = arith.constant 1 : index
    %25 = vector.load %arg8[%c0_30, %c0_31, %c1_32] : memref<4x10x18xf32, #tpu.memory_space<vmem>>, vector<4x8x16xf32>
    %26 = vector.extract_strided_slice %17 {offsets = [1, 0, 0, 0], sizes = [1, 4, 1, 1], strides = [1, 1, 1, 1]} : vector<9x4x1x1xf32> to vector<1x4x1x1xf32>
    %27 = vector.shape_cast %26 : vector<1x4x1x1xf32> to vector<4x1x1xf32>
    %28 = vector.broadcast %27 : vector<4x1x1xf32> to vector<4x8x16xf32>
    %29 = arith.mulf %25, %28 : vector<4x8x16xf32>
    %30 = arith.addf %24, %29 : vector<4x8x16xf32>
    %c0_33 = arith.constant 0 : index
    %c0_34 = arith.constant 0 : index
    %c2 = arith.constant 2 : index
    %31 = vector.load %arg8[%c0_33, %c0_34, %c2] : memref<4x10x18xf32, #tpu.memory_space<vmem>>, vector<4x8x16xf32>
    %32 = vector.extract_strided_slice %17 {offsets = [2, 0, 0, 0], sizes = [1, 4, 1, 1], strides = [1, 1, 1, 1]} : vector<9x4x1x1xf32> to vector<1x4x1x1xf32>
    %33 = vector.shape_cast %32 : vector<1x4x1x1xf32> to vector<4x1x1xf32>
    %34 = vector.broadcast %33 : vector<4x1x1xf32> to vector<4x8x16xf32>
    %35 = arith.mulf %31, %34 : vector<4x8x16xf32>
    %36 = arith.addf %30, %35 : vector<4x8x16xf32>
    %c0_35 = arith.constant 0 : index
    %c1_36 = arith.constant 1 : index
    %c0_37 = arith.constant 0 : index
    %37 = vector.load %arg8[%c0_35, %c1_36, %c0_37] : memref<4x10x18xf32, #tpu.memory_space<vmem>>, vector<4x8x16xf32>
    %38 = vector.extract_strided_slice %17 {offsets = [3, 0, 0, 0], sizes = [1, 4, 1, 1], strides = [1, 1, 1, 1]} : vector<9x4x1x1xf32> to vector<1x4x1x1xf32>
    %39 = vector.shape_cast %38 : vector<1x4x1x1xf32> to vector<4x1x1xf32>
    %40 = vector.broadcast %39 : vector<4x1x1xf32> to vector<4x8x16xf32>
    %41 = arith.mulf %37, %40 : vector<4x8x16xf32>
    %42 = arith.addf %36, %41 : vector<4x8x16xf32>
    %c0_38 = arith.constant 0 : index
    %c1_39 = arith.constant 1 : index
    %c1_40 = arith.constant 1 : index
    %43 = vector.load %arg8[%c0_38, %c1_39, %c1_40] : memref<4x10x18xf32, #tpu.memory_space<vmem>>, vector<4x8x16xf32>
    %44 = vector.extract_strided_slice %17 {offsets = [4, 0, 0, 0], sizes = [1, 4, 1, 1], strides = [1, 1, 1, 1]} : vector<9x4x1x1xf32> to vector<1x4x1x1xf32>
    %45 = vector.shape_cast %44 : vector<1x4x1x1xf32> to vector<4x1x1xf32>
    %46 = vector.broadcast %45 : vector<4x1x1xf32> to vector<4x8x16xf32>
    %47 = arith.mulf %43, %46 : vector<4x8x16xf32>
    %48 = arith.addf %42, %47 : vector<4x8x16xf32>
    %c0_41 = arith.constant 0 : index
    %c1_42 = arith.constant 1 : index
    %c2_43 = arith.constant 2 : index
    %49 = vector.load %arg8[%c0_41, %c1_42, %c2_43] : memref<4x10x18xf32, #tpu.memory_space<vmem>>, vector<4x8x16xf32>
    %50 = vector.extract_strided_slice %17 {offsets = [5, 0, 0, 0], sizes = [1, 4, 1, 1], strides = [1, 1, 1, 1]} : vector<9x4x1x1xf32> to vector<1x4x1x1xf32>
    %51 = vector.shape_cast %50 : vector<1x4x1x1xf32> to vector<4x1x1xf32>
    %52 = vector.broadcast %51 : vector<4x1x1xf32> to vector<4x8x16xf32>
    %53 = arith.mulf %49, %52 : vector<4x8x16xf32>
    %54 = arith.addf %48, %53 : vector<4x8x16xf32>
    %c0_44 = arith.constant 0 : index
    %c2_45 = arith.constant 2 : index
    %c0_46 = arith.constant 0 : index
    %55 = vector.load %arg8[%c0_44, %c2_45, %c0_46] : memref<4x10x18xf32, #tpu.memory_space<vmem>>, vector<4x8x16xf32>
    %56 = vector.extract_strided_slice %17 {offsets = [6, 0, 0, 0], sizes = [1, 4, 1, 1], strides = [1, 1, 1, 1]} : vector<9x4x1x1xf32> to vector<1x4x1x1xf32>
    %57 = vector.shape_cast %56 : vector<1x4x1x1xf32> to vector<4x1x1xf32>
    %58 = vector.broadcast %57 : vector<4x1x1xf32> to vector<4x8x16xf32>
    %59 = arith.mulf %55, %58 : vector<4x8x16xf32>
    %60 = arith.addf %54, %59 : vector<4x8x16xf32>
    %c0_47 = arith.constant 0 : index
    %c2_48 = arith.constant 2 : index
    %c1_49 = arith.constant 1 : index
    %61 = vector.load %arg8[%c0_47, %c2_48, %c1_49] : memref<4x10x18xf32, #tpu.memory_space<vmem>>, vector<4x8x16xf32>
    %62 = vector.extract_strided_slice %17 {offsets = [7, 0, 0, 0], sizes = [1, 4, 1, 1], strides = [1, 1, 1, 1]} : vector<9x4x1x1xf32> to vector<1x4x1x1xf32>
    %63 = vector.shape_cast %62 : vector<1x4x1x1xf32> to vector<4x1x1xf32>
    %64 = vector.broadcast %63 : vector<4x1x1xf32> to vector<4x8x16xf32>
    %65 = arith.mulf %61, %64 : vector<4x8x16xf32>
    %66 = arith.addf %60, %65 : vector<4x8x16xf32>
    %c0_50 = arith.constant 0 : index
    %c2_51 = arith.constant 2 : index
    %c2_52 = arith.constant 2 : index
    %67 = vector.load %arg8[%c0_50, %c2_51, %c2_52] : memref<4x10x18xf32, #tpu.memory_space<vmem>>, vector<4x8x16xf32>
    %68 = vector.extract_strided_slice %17 {offsets = [8, 0, 0, 0], sizes = [1, 4, 1, 1], strides = [1, 1, 1, 1]} : vector<9x4x1x1xf32> to vector<1x4x1x1xf32>
    %69 = vector.shape_cast %68 : vector<1x4x1x1xf32> to vector<4x1x1xf32>
    %70 = vector.broadcast %69 : vector<4x1x1xf32> to vector<4x8x16xf32>
    %71 = arith.mulf %67, %70 : vector<4x8x16xf32>
    %72 = arith.addf %66, %71 : vector<4x8x16xf32>
    %c0_53 = arith.constant 0 : index
    %c0_54 = arith.constant 0 : index
    %c0_55 = arith.constant 0 : index
    %c0_56 = arith.constant 0 : index
    %73 = vector.load %arg6[%c0_53, %c0_54, %c0_55, %c0_56] : memref<4x8x1x1xf32, #tpu.memory_space<vmem>>, vector<4x8x1x1xf32>
    %cst_57 = arith.constant 0.000000e+00 : f32
    %74 = vector.broadcast %cst_57 : f32 to vector<8x8x16xf32>
    %75 = vector.extract_strided_slice %72 {offsets = [0, 0, 0], sizes = [1, 8, 16], strides = [1, 1, 1]} : vector<4x8x16xf32> to vector<1x8x16xf32>
    %76 = vector.extract_strided_slice %73 {offsets = [0, 0, 0, 0], sizes = [1, 8, 1, 1], strides = [1, 1, 1, 1]} : vector<4x8x1x1xf32> to vector<1x8x1x1xf32>
    %77 = vector.shape_cast %76 : vector<1x8x1x1xf32> to vector<8x1x1xf32>
    %78 = vector.broadcast %75 : vector<1x8x16xf32> to vector<8x8x16xf32>
    %79 = vector.broadcast %77 : vector<8x1x1xf32> to vector<8x8x16xf32>
    %80 = arith.mulf %78, %79 : vector<8x8x16xf32>
    %81 = arith.addf %74, %80 : vector<8x8x16xf32>
    %82 = vector.extract_strided_slice %72 {offsets = [1, 0, 0], sizes = [1, 8, 16], strides = [1, 1, 1]} : vector<4x8x16xf32> to vector<1x8x16xf32>
    %83 = vector.extract_strided_slice %73 {offsets = [1, 0, 0, 0], sizes = [1, 8, 1, 1], strides = [1, 1, 1, 1]} : vector<4x8x1x1xf32> to vector<1x8x1x1xf32>
    %84 = vector.shape_cast %83 : vector<1x8x1x1xf32> to vector<8x1x1xf32>
    %85 = vector.broadcast %82 : vector<1x8x16xf32> to vector<8x8x16xf32>
    %86 = vector.broadcast %84 : vector<8x1x1xf32> to vector<8x8x16xf32>
    %87 = arith.mulf %85, %86 : vector<8x8x16xf32>
    %88 = arith.addf %81, %87 : vector<8x8x16xf32>
    %89 = vector.extract_strided_slice %72 {offsets = [2, 0, 0], sizes = [1, 8, 16], strides = [1, 1, 1]} : vector<4x8x16xf32> to vector<1x8x16xf32>
    %90 = vector.extract_strided_slice %73 {offsets = [2, 0, 0, 0], sizes = [1, 8, 1, 1], strides = [1, 1, 1, 1]} : vector<4x8x1x1xf32> to vector<1x8x1x1xf32>
    %91 = vector.shape_cast %90 : vector<1x8x1x1xf32> to vector<8x1x1xf32>
    %92 = vector.broadcast %89 : vector<1x8x16xf32> to vector<8x8x16xf32>
    %93 = vector.broadcast %91 : vector<8x1x1xf32> to vector<8x8x16xf32>
    %94 = arith.mulf %92, %93 : vector<8x8x16xf32>
    %95 = arith.addf %88, %94 : vector<8x8x16xf32>
    %96 = vector.extract_strided_slice %72 {offsets = [3, 0, 0], sizes = [1, 8, 16], strides = [1, 1, 1]} : vector<4x8x16xf32> to vector<1x8x16xf32>
    %97 = vector.extract_strided_slice %73 {offsets = [3, 0, 0, 0], sizes = [1, 8, 1, 1], strides = [1, 1, 1, 1]} : vector<4x8x1x1xf32> to vector<1x8x1x1xf32>
    %98 = vector.shape_cast %97 : vector<1x8x1x1xf32> to vector<8x1x1xf32>
    %99 = vector.broadcast %96 : vector<1x8x16xf32> to vector<8x8x16xf32>
    %100 = vector.broadcast %98 : vector<8x1x1xf32> to vector<8x8x16xf32>
    %101 = arith.mulf %99, %100 : vector<8x8x16xf32>
    %102 = arith.addf %95, %101 : vector<8x8x16xf32>
    %c0_58 = arith.constant 0 : index
    %c0_59 = arith.constant 0 : index
    %c0_60 = arith.constant 0 : index
    %c0_61 = arith.constant 0 : index
    %103 = vector.load %arg7[%c0_58, %c0_59, %c0_60, %c0_61] : memref<1x8x8x16xf32, #tpu.memory_space<vmem>>, vector<1x8x8x16xf32>
    %104 = vector.shape_cast %103 : vector<1x8x8x16xf32> to vector<8x8x16xf32>
    %105 = vector.shape_cast %102 : vector<8x8x16xf32> to vector<1x8x8x16xf32>
    tpu.vector_store %arg7[%c0_58, %c0_59, %c0_60, %c0_61], %105 {strides = array<i32>} : memref<1x8x8x16xf32, #tpu.memory_space<vmem>>, vector<1x8x8x16xf32>,
    return
  }
  func.func @transform_0(%arg0: i32, %arg1: i32) -> (i32, i32, i32, i32) {
    %c0_i32 = arith.constant 0 : i32
    %c0_i32_0 = arith.constant 0 : i32
    %c0_i32_1 = arith.constant 0 : i32
    return %arg0, %c0_i32, %arg1, %c0_i32_0 : i32, i32, i32, i32
  }
  func.func @transform_1(%arg0: i32, %arg1: i32) -> (i32, i32, i32, i32) {
    %c1_i32 = arith.constant 1 : i32
    %0 = arith.muli %arg1, %c1_i32 : i32
    %c1_i32_0 = arith.constant 1 : i32
    %1 = arith.subi %0, %c1_i32_0 : i32
    %c0_i32 = arith.constant 0 : i32
    %2 = arith.maxsi %1, %c0_i32 : i32
    %c0_i32_1 = arith.constant 0 : i32
    %c0_i32_2 = arith.constant 0 : i32
    %c0_i32_3 = arith.constant 0 : i32
    return %arg0, %c0_i32_1, %2, %c0_i32_2 : i32, i32, i32, i32
  }
  func.func @transform_2(%arg0: i32, %arg1: i32) -> (i32, i32, i32, i32) {
    %c1_i32 = arith.constant 1 : i32
    %0 = arith.addi %arg1, %c1_i32 : i32
    %c1_i32_0 = arith.constant 1 : i32
    %1 = arith.muli %0, %c1_i32_0 : i32
    %c1_i32_1 = arith.constant 1 : i32
    %2 = arith.minsi %1, %c1_i32_1 : i32
    %c0_i32 = arith.constant 0 : i32
    %c0_i32_2 = arith.constant 0 : i32
    %c0_i32_3 = arith.constant 0 : i32
    return %arg0, %c0_i32, %2, %c0_i32_2 : i32, i32, i32, i32
  }
  func.func @transform_3(%arg0: i32, %arg1: i32) -> (i32, i32, i32, i32) {
    %c0_i32 = arith.constant 0 : i32
    %c0_i32_0 = arith.constant 0 : i32
    %c0_i32_1 = arith.constant 0 : i32
    %c0_i32_2 = arith.constant 0 : i32
    %c0_i32_3 = arith.constant 0 : i32
    return %c0_i32, %c0_i32_0, %c0_i32_1, %c0_i32_2 : i32, i32, i32, i32
  }
  func.func @transform_4(%arg0: i32, %arg1: i32) -> (i32, i32, i32, i32) {
    %c0_i32 = arith.constant 0 : i32
    %c0_i32_0 = arith.constant 0 : i32
    %c0_i32_1 = arith.constant 0 : i32
    %c0_i32_2 = arith.constant 0 : i32
    %c0_i32_3 = arith.constant 0 : i32
    return %c0_i32, %c0_i32_0, %c0_i32_1, %c0_i32_2 : i32, i32, i32, i32
  }
  func.func @transform_5(%arg0: i32, %arg1: i32) -> (i32, i32, i32, i32) {
    %c0_i32 = arith.constant 0 : i32
    %c0_i32_0 = arith.constant 0 : i32
    %c0_i32_1 = arith.constant 0 : i32
    return %arg0, %c0_i32, %arg1, %c0_i32_0 : i32, i32, i32, i32
  }
}

</mosaic_0001>

<bundles_post_ra>
// kernel: tpu_custom_call.1
= control target key start
LH: loop header
LB: loop body
LE: loop exit
PB: predicated region body
PF: predicated region fallthrough
CT: control target
= control target key end

     0   :  { %s2610_s0 = inlined_call_operand.hbm [shape: f32[2,4,16,16], index: 0, kind: input, shape index: {}]   ;;  %s2611_s1 = inlined_call_operand.hbm [shape: f32[2,4,16,16], index: 1, kind: input, shape index: {}]   ;;  %s2612_s2 = inlined_call_operand.hbm [shape: f32[2,4,16,16], index: 2, kind: input, shape index: {}]   ;;  %s2613_s3 = inlined_call_operand.vmem [shape: f32[9,4,1,1], index: 3, kind: input, shape index: {}]   ;;  %s2614_s4 = inlined_call_operand.vmem [shape: f32[4,8,1,1], index: 4, kind: input, shape index: {}]   ;;  %s2615_s5 = inlined_call_operand.hbm [shape: f32[2,8,16,16], index: 5, kind: output, shape index: {}]  }
   0x1   :  { %2638 = sst [smem:[#allocation25_spill]] %s2611_s1 }
   0x2   :  { %2639 = sst [smem:[#allocation26_spill]] %s2613_s3 }
   0x3   :  { %2640 = sst [smem:[#allocation27_spill]] %s2614_s4 }
   0x4   :  { %2641 = sst [smem:[#allocation28_spill]] %s2615_s5 }
   0x5   :  { %10 = vsyncpa [#allocation4], 0 }
   0x6   :  { %12 = vsyncpa [#allocation4 + $0x1], 0 }
   0x7   :  { %13 = vsyncpa [#allocation7], 0 }
   0x8   :  { %15 = vsyncpa [#allocation7 + $0x1], 0 }
   0x9   :  { %16 = vsyncpa [#allocation5], 0 }
   0xa   :  { %18 = vsyncpa [#allocation5 + $0x1], 0  ;;  %s1889_s18 = smov 0   ;;  %s1891_s19 = smov 0  }
   0xb   :  { %s1893_s20 = smov 0   ;;  %s1895_s21 = smov 0  }
   0xc   :  { %s1897_s22 = smov 0   ;;  %s1899_s23 = smov 0  }
   0xd   :  { %s1901_s24 = smov 0   ;;  %s1903_s25 = smov 0  }
   0xe   :  { %s1905_s26 = smov 0   ;;  %s1907_s27 = smov 0  }
   0xf   :  { %s1909_s28 = smov 0   ;;  %s1911_s29 = smov 0  }
  0x10   :  { %s1913_s30 = smov 0   ;;  %s1915_s6 = smov 0  }
  0x11 LB: > { %2642 = sst [smem:[#allocation14_spill]] %s1814_s23  ;;  %s1958_s7 = sadd.s32 4294967295, %s1846_s6   ;;  %s1846_s6 = sphi %s1915_s6, %s24_s6   ;;  %s1842_s30 = sphi %s1913_s30, %s2701_s30   ;;  %s1838_s29 = sphi %s1911_s29, %s2690_s29   ;;  %s1834_s28 = sphi %s1909_s28, %s2700_s28   ;;  %s1830_s27 = sphi %s1907_s27, %s2689_s27   ;;  %s1826_s26 = sphi %s1905_s26, %s2688_s26   ;;  %s1822_s25 = sphi %s1903_s25, %s2699_s25   ;;  %s1818_s24 = sphi %s1901_s24, %s2698_s24   ;;  %s1814_s23 = sphi %s1899_s23, %s2686_s23   ;;  %s1810_s22 = sphi %s1897_s22, %s2697_s22   ;;  %s1806_s21 = sphi %s1895_s21, %s2696_s21   ;;  %s1802_s20 = sphi %s1893_s20, %s2695_s20   ;;  %s1798_s19 = sphi %s1891_s19, %s2694_s19   ;;  %s1794_s18 = sphi %s1889_s18, %s2693_s18  }
  0x12   : > { %2643 = sst [smem:[#allocation15_spill]] %s1826_s26  ;;  %s33_s8 = sadd.s32 1, %s1838_s29 }
  0x13   : > { %2644 = sst [smem:[#allocation16_spill]] %s1830_s27  ;;  %p34_p0 = scmp.ge.s32.totalorder %s33_s8, 2 }
  0x14   : > { %2645 = sst [smem:[#allocation17_spill]] %s1834_s28  ;;  %s36_s9 = sadd.s32 1, %s1842_s30 }
  0x15   : > { %2646 = sst [smem:[#allocation18_spill]] %s1838_s29  ;;  %p53_p1 = scmp.eq.s32.totalorder %s1846_s6, 0 }
  0x16   : > { %p2627_p2 = scmp.eq.s32.totalorder %s1958_s7, 0  ;;  %s2703_s8 = smov (%p34_p0, %s33_s8), 0 }
  0x17   : > { %2647 = sst [smem:[#allocation19_spill]] %s2703_s8  ;;  %s2705_s9 = smov (!%p34_p0, %s36_s9), %s1842_s30 }
  0x18   : > { %s41_s10 = ssub.s32 %s1838_s29, %s2703_s8  ;;  %p38_p3 = scmp.ge.s32.totalorder %s2705_s9, 2 }
  0x19   : > { %s79_s11 = sadd.s32 1, %s1814_s23  ;;  %p86_p4 = scmp.ne.s32.totalorder %s1814_s23, %s1810_s22 }
  0x1a   : > { %s2707_s9 = smov (%p38_p3, %s2705_s9), 0  ;;  %p92_p6 = scmp.ne.s32.totalorder %s1810_s22, %s1806_s21 }
  0x1b   : > { %2648 = sst [smem:[#allocation20_spill]] %s2707_s9  ;;  %s1974_s12 = ssub.s32 %s1842_s30, %s2707_s9 }
  0x1c   : > { %s1977_s13 = sor.u32 %s41_s10, %s1974_s12  ;;  %p1985_p7 = por %p86_p4, %p53_p1 }
  0x1d   : > { %p43_p5 = scmp.eq.s32.totalorder %s1977_s13, 0  ;;  %p1991_p8 = por %p92_p6, %p2627_p2 }
  0x1e   : > { %p2626_p9 = scmp.lt.s32.totalorder %s1846_s6, 4  ;;  %p2625_p10 = scmp.eq.s32.totalorder %s1974_s12, 0 }
  0x1f   : > { %s2650_s15 = scalar_select %p1991_p8, 1, 0 }
  0x20   : > { %s1361_s16 = sshll.u32 %s1842_s30, 3  ;;  %s249_s21 = sand.u32 1, %s1846_s6  }
  0x21   : > { %2651 = sst [smem:[#allocation21_spill]] %s2650_s15  ;;  %s251_s10 = sand.u32 1, %s1814_s23  }
  0x22   : > { %s2001_s17 = scalar_select %p2625_p10, %s1814_s23, %s79_s11  }
  0x23   : > { %s1363_s9 = sshll.u32 %s251_s10, 5  ;;  %s2624_s8 = sshll.u32 %s1842_s30, 6 }
  0x24   : > { %2652 = sst [smem:[#allocation22_spill]] %s2001_s17  ;;  %s253_s3 = scalar_lea.vmem [#allocation6], %s1363_s9 }
  0x25   : > { %s2653_s1 = sld [smem:[#allocation25_spill]]  ;;  %s2011_s27 = sshll.u32 %s253_s3, 4  ;;  %s266_s27 = int_to_ptr.vmem [resolvable:$true] %s2011_s27 }
  0x26   : > { %p2018_p11 = pnand %p2626_p9, %p1985_p7  ;;  %p1370_p12 = scmp.ge.s32.totalorder %s1846_s6, 1 }
  0x27   : > { %p299_p13 = scmp.lt.s32.totalorder %s1846_s6, 5  ;;  %s2024_s10 = scalar_lea.sflag [#allocation7], %s249_s21 }
  0x28   : > { %p1602_p3 = pneg %p2018_p11 }
  0x2b   : > { %s262_s4 = scalar_lea.hbm %s2653_s1, %s2624_s8  ;;  %s1605_s9 = scalar_lea.hbm %s2653_s1, 128 }
  0x2c   : > { %s263_s15 = sshll.u32 %s262_s4, 4  ;;  %s264_s15 = int_to_ptr.hbm [resolvable:$true] %s263_s15 }
  0x2d   : > { %s1598_s5 = sshra.s32 %s264_s15, 4  ;;  %s1599_s5 = int_to_ptr.hbm [resolvable:$true] %s1598_s5 }
  0x2e   : > { %s1600_s28 = scalar_lea.hbm %s1599_s5, 32  ;;  %p1606_p7 = scmp.lt.s32.totalorder %s1599_s5, %s2653_s1 }
  0x2f   : > { %p1601_p0 = scmp.ne.s32.totalorder %s1599_s5, %s1600_s28  ;;  %p1607_p10 = scmp.lt.s32.totalorder %s1605_s9, %s1600_s28 }
  0x31   : > { %p1603_p4 = pnand %p1602_p3, %p1601_p0  ;;  %p1608_p9 = por %p1607_p10, %p1606_p7 }
  0x33   : > { %p1604_p6 = pneg %p1603_p4 }
  0x35   : > { %p1609_p2 = pnand %p1608_p9, %p1604_p6 }
  0x37   : > { %1612 = shalt.err (!%p1609_p2)
}
  0x38   : > { %s2628_s21 = smov 256   ;;  %s2630_s8 = smov 128  }
  0x39   : > { %s2632_s5 = smov 8   ;;  %p2044_p2 = pnand %p1370_p12, %p299_p13 }
  0x3a   : > { %1394 = dma.hbm_to_vmem [thread:$0]  (!%p2018_p11), %s264_s15, 512, %s266_s27, %s2024_s10, %s2628_s21, %s2630_s8, %s2632_s5  }
  0x3b   : > { %s1355_s3 = sadd.s32 4294967294, %s1846_s6   ;;  %s45_s4 = sadd.s32 1, %s1826_s26 }
  0x3c   : > { %s2053_s9 = scalar_select %p43_p5, %s1826_s26, %s45_s4  }
  0x3d   : > { %p52_p9 = scmp.ne.s32.totalorder %s1826_s26, %s1822_s25  ;;  %p58_p10 = scmp.ne.s32.totalorder %s1822_s25, %s1818_s24 }
  0x3e   : > { %2656 = sst [smem:[#allocation23_spill]] %s2053_s9  ;;  %p194_p0 = scmp.eq.s32.totalorder %s1958_s7, 3 }
  0x3f   : > { %p200_p3 = scmp.eq.s32.totalorder %s1355_s3, 3  ;;  %p2062_p4 = por %p53_p1, %p52_p9 }
  0x40   : > { %p2658_p11 = scmp.eq.s32.totalorder %s1958_s7, 0  ;;  %p2072_p13 = por %p194_p0, %p52_p9 }
  0x41   : > { %p2076_p5 = por %p200_p3, %p58_p10  ;;  %s226_s14 = sand.u32 1, %s1826_s26  }
  0x42   : > { %p2068_p12 = por %p2658_p11, %p58_p10  ;;  %s234_s3 = sadd.s32 %s1838_s29, %s1361_s16 }
  0x43   : > { %s2661_s15 = scalar_select %p2076_p5, 1, 0 }
  0x44   : > { %s1360_s4 = sshll.u32 %s226_s14, 5  ;;  %s1362_s21 = sshll.u32 %s234_s3, 3 }
  0x45   : > { %2662 = sst [smem:[#allocation24_spill]] %s2661_s15  ;;  %s236_s1 = scalar_lea.hbm %s2610_s0, %s1362_s21 }
  0x46   : > { %s230_s9 = scalar_lea.vmem [#allocation3], %s1360_s4  ;;  %s237_s23 = sshll.u32 %s236_s1, 4  ;;  %s238_s23 = int_to_ptr.hbm [resolvable:$true] %s237_s23 }
  0x47   : > { %s239_s17 = sshll.u32 %s230_s9, 4  ;;  %p2663_p6 = scmp.lt.s32.totalorder %s1846_s6, 4  ;;  %s240_s17 = int_to_ptr.vmem [resolvable:$true] %s239_s17 }
  0x48   : > { %s227_s16 = scalar_lea.sflag [#allocation4], %s226_s14  ;;  %s2664_s29 = smov 8  }
  0x49   : > { %p1389_p7 = pnand %p2663_p6, %p2062_p4  ;;  %s2665_s26 = smov 128  }
  0x4a   : > { %s2666_s15 = smov 256   ;;  %s113_s3 = sadd.s32 1, %s1802_s20 }
  0x4b   : > { %1391 = dma.hbm_to_vmem [thread:$0]  (!%p1389_p7), %s238_s23, 512, %s240_s17, %s227_s16, %s2666_s15, %s2665_s26, %s2664_s29  }
  0x4c   : > { %p120_p9 = scmp.ne.s32.totalorder %s1802_s20, %s1798_s19  ;;  %p126_p10 = scmp.ne.s32.totalorder %s1798_s19, %s1794_s18 }
  0x4d   : > { %s277_s21 = sand.u32 1, %s1802_s20   ;;  %p2667_p3 = pmov %p2658_p11 }
  0x4e   : > { %p122_p0 = por %p120_p9, %p53_p1  ;;  %s1367_s8 = sshll.u32 %s277_s21, 5 }
  0x4f   : > { %p2104_p11 = por %p126_p10, %p2667_p3  ;;  %s2669_s5 = sshll.u32 %s1842_s30, 6 }
  0x50   : > { %s1790_s9 = sadd.s32 8, %s2669_s5  ;;  %s279_s11 = scalar_lea.vmem [#allocation8], %s1367_s8 }
  0x51   : > { %s291_s14 = sshll.u32 %s279_s11, 4  ;;  %p2670_p4 = scmp.eq.s32.totalorder %s1974_s12, 0  ;;  %s292_s14 = int_to_ptr.vmem [resolvable:$true] %s291_s14 }
  0x52   : > { %s288_s18 = scalar_lea.hbm %s2612_s2, %s1790_s9  ;;  %p2671_p1 = pmov %p2663_p6 }
  0x53   : > { %s2113_s4 = scalar_select %p2670_p4, %s1802_s20, %s113_s3  }
  0x54   : > { %s289_s16 = sshll.u32 %s288_s18, 4  ;;  %p1395_p6 = pnand %p2671_p1, %p122_p0  ;;  %s290_s16 = int_to_ptr.hbm [resolvable:$true] %s289_s16 }
  0x55   : > { %303 = sbr.rel (%p2044_p2) target bundleno = 792 (0x318), region = 40  ;;  %s2127_s12 = sand.u32 (!%p2044_p2), 1, %s1822_s25  }
  0x56   : > { %1397 = dma.hbm_to_vmem [thread:$0]  (!%p1395_p6), %s290_s16, 512, %s292_s14, %s2024_s10, %s2666_s15, %s2665_s26, %s2664_s29  }
  0x57   : > { %s1371_s3 = sshll.u32 (!%p2044_p2), %s2127_s12, 5  ;;  %s306_s21 = scalar_lea.sflag (!%p2044_p2), [#allocation4], %s2127_s12 }
  0x58   : > { %s2131_s8 = scalar_lea.vmem (!%p2044_p2), [#allocation3], %s1371_s3 }
  0x5a   : > { %1773 = dma.done.wait (%p2068_p12), %s306_s21, 512  }
  0x5b   : > { %1775 = vsyncadd (%p2068_p12), %s306_s21, 4294966784  ;;  %s315_s29 = sand.u32 1, %s1958_s7   ;;  %s317_s10 = sand.u32 1, %s1810_s22  }
  0x5c   : > { %s1372_s28 = sshll.u32 %s317_s10, 5  ;;  %s316_s15 = scalar_lea.sflag [#allocation7], %s315_s29 }
  0x5d   : > { %s2139_s5 = scalar_lea.vmem [#allocation6], %s1372_s28 }
  0x5e   : > { %1777 = dma.done.wait (%p1991_p8), %s316_s15, 512  }
  0x5f   : > { %1779 = vsyncadd (%p1991_p8), %s316_s15, 4294966784  ;;  %s327_s9 = sand.u32 1, %s1798_s19  }
  0x60   : > { %s1373_s11 = sshll.u32 %s327_s9, 5 }
  0x61   : > { %s2146_s27 = scalar_lea.vmem [#allocation8], %s1373_s11 }
  0x62   : > { %1781 = dma.done.wait (%p2104_p11), %s316_s15, 512  }
  0x63   : > { %1783 = vsyncadd (%p2104_p11), %s316_s15, 4294966784  ;;  %s2673_s7 = sld [smem:[#allocation16_spill]]  ;;  %v1851_v0 = vmov 0   ;;  %v387_v3 = vld [vmem:[%s2131_s8 + $0x10] sm:$0xff]  ;;  %v385_v4 = vld [vmem:[%s2131_s8] sm:$0xff]  ;;  %s1852_s1 = smov 1  }
  0x64   : > { %1528 = vset.pattern.permute.xlu1 %v1851_v0  ;;  %1527 = vset.pattern.permute.xlu0 %v1851_v0  ;;  %v410_v5 = vld [vmem:[%s2139_s5 + $0x7] sm:$0x1]  ;;  %v411_v7 = vld [vmem:[%s2139_s5 + $0xf] sm:$0x1]  ;;  %v388_v8 = vld [vmem:[%s2131_s8 + $0x18] sm:$0xff]  ;;  %s2678_s16 = sld [smem:[#allocation26_spill]] }
  0x65   : > { %1529 = vset.pattern.permute.xlu2 %v1851_v0  ;;  %397 = vrot.lane.b32.xlu1 %v387_v3, %s1852_s1  ;;  %v386_v9 = vld [vmem:[%s2131_s8 + $0x8] sm:$0xff]  ;;  %v413_v10 = vld [vmem:[%s2139_s5 + $0x1f] sm:$0x1]  ;;  %v412_v13 = vld [vmem:[%s2139_s5 + $0x17] sm:$0x1]  ;;  %vm375_vm2 = vcmask 146432  }
  0x66   : > { %393 = vrot.lane.b32.xlu0 %v385_v4, %s1852_s1  ;;  %v414_v17 = vld [vmem:[%s2146_s27] sm:$0x1]  ;;  %v416_v18 = vld [vmem:[%s2146_s27 + $0x10] sm:$0x1]  ;;  %v415_v19 = vld [vmem:[%s2146_s27 + $0x8] sm:$0x1] }
  0x67   : > { %v417_v23 = vld [vmem:[%s2146_s27 + $0x18] sm:$0x1]  ;;  %v1853_v37 = vmov 0.0   ;;  %vm377_vm3 = vcmask 140288   ;;  %vm441_vm4 = vcmask 131080   ;;  %vm405_vm5 = vcmask 138248  }
  0x68   : > { %376 = vst.msk [vmem:[#allocation2] sm:$0xff] %vm375_vm2, %v1853_v37  ;;  %s2679_s15 = sld [smem:[#allocation27_spill]]  ;;  %vm1193_vm6 = vcmask 130048  }
  0x69   : > { %p373_p2 = scmp.eq.s32.totalorder %s2673_s7, 0  ;;  %p374_p8 = scmp.eq.s32.totalorder %s2673_s7, 1  ;;  %379 = vst.msk [vmem:[#allocation2 + $0x10] sm:$0xff] %vm375_vm2, %v1853_v37 }
  0x6a   : > { %v1530_v25 = vld [vmem:[%s2678_s16 + $0x1] ss:$0 sm:$0xff]  ;;  %v1531_v26 = vld [vmem:[%s2678_s16] ss:$0 sm:$0xff]  ;;  %v1532_v27 = vld [vmem:[%s2678_s16 + $0x2] ss:$0 sm:$0xff] }
  0x6b   : > { %s418_s14 = scalar_select %p373_p2, 1, 0  ;;  %v1533_v28 = vld [vmem:[%s2678_s16 + $0x3] ss:$0 sm:$0xff]  ;;  %v1534_v29 = vld [vmem:[%s2678_s16 + $0x5] ss:$0 sm:$0xff] }
  0x6c   : > { %s446_s23 = scalar_select %p374_p8, 1, 0  ;;  %v1535_v30 = vld [vmem:[%s2678_s16 + $0x4] ss:$0 sm:$0xff]  ;;  %v1536_v31 = vld [vmem:[%s2678_s16 + $0x6] ss:$0 sm:$0xff] }
  0x6d   : > { %v419_v1 = vstv %s418_s14  ;;  %399 = vrot.lane.b32.xlu1 %v388_v8, %s1852_s1  ;;  %v1537_v32 = vld [vmem:[%s2678_s16 + $0xa] ss:$0 sm:$0xff]  ;;  %v1538_v33 = vld [vmem:[%s2678_s16 + $0x7] ss:$0 sm:$0xff]  ;;  %381 = vst.msk [vmem:[#allocation2 + $0x20] sm:$0xff] %vm375_vm2, %v1853_v37  ;;  %s1854_s14 = smov 127  }
  0x6e   : > { %vm2153_vm0 = vcmp.eq.s32.totalorder %v419_v1, 1  ;;  %v447_v11 = vstv %s446_s23  ;;  %395 = vrot.lane.b32.xlu0 %v386_v9, %s1852_s1  ;;  %v1539_v34 = vld [vmem:[%s2678_s16 + $0x8] ss:$0 sm:$0xff]  ;;  %v1540_v35 = vld [vmem:[%s2678_s16 + $0xc] ss:$0 sm:$0xff]  ;;  %383 = vst.msk [vmem:[#allocation2 + $0x30] sm:$0xff] %vm375_vm2, %v1853_v37 }
  0x6f   : > { %v421_v6 = vsel %vm2153_vm0, 0.0, %v410_v5  ;;  %v422_v12 = vsel %vm2153_vm0, 0.0, %v411_v7  ;;  %vm2175_vm1 = vcmp.eq.s32.totalorder %v447_v11, 1  ;;  %v424_v15 = vsel %vm2153_vm0, 0.0, %v413_v10  ;;  %v1541_v36 = vld [vmem:[%s2678_s16 + $0x9] ss:$0 sm:$0xff] }
  0x70   : > { %429 = vrot.lane.b32.xlu2 %v421_v6, %s1852_s1  ;;  %v423_v16 = vsel %vm2153_vm0, 0.0, %v412_v13  ;;  %v449_v20 = vsel %vm2175_vm1, 0.0, %v414_v17  ;;  %v451_v21 = vsel %vm2175_vm1, 0.0, %v416_v18  ;;  %v450_v22 = vsel %vm2175_vm1, 0.0, %v415_v19  ;;  %v1542_v38 = vld [vmem:[%s2678_s16 + $0xb] ss:$0 sm:$0xff] }
  0x71   : > { %v452_v24 = vsel %vm2175_vm1, 0.0, %v417_v23  ;;  %v1543_v39 = vld [vmem:[%s2678_s16 + $0xf] ss:$0 sm:$0xff]  ;;  %v1544_v40 = vld [vmem:[%s2678_s16 + $0xe] ss:$0 sm:$0xff]  ;;  %s2680_s5 = sld [smem:[#allocation17_spill]] }
  0x72   : > { %v1545_v41 = vld [vmem:[%s2678_s16 + $0xd] ss:$0 sm:$0xff]  ;;  %v1546_v42 = vld [vmem:[%s2678_s16 + $0x12] ss:$0 sm:$0xff]  ;;  %v1547_v43 = vld [vmem:[%s2678_s16 + $0x11] ss:$0 sm:$0xff] }
  0x73   : > { %378 = vst.msk [vmem:[#allocation2 + $0x8] sm:$0x3] %vm377_vm3, %v1853_v37  ;;  %v1548_v44 = vld [vmem:[%s2678_s16 + $0x10] ss:$0 sm:$0xff]  ;;  %v1549_v45 = vld [vmem:[%s2678_s16 + $0x14] ss:$0 sm:$0xff] }
  0x74   : > { %380 = vst.msk [vmem:[#allocation2 + $0x18] sm:$0x3] %vm377_vm3, %v1853_v37  ;;  %v1550_v46 = vld [vmem:[%s2678_s16 + $0x16] ss:$0 sm:$0xff]  ;;  %v1551_v47 = vld [vmem:[%s2678_s16 + $0x13] ss:$0 sm:$0xff] }
  0x75   : > { %435 = vrot.lane.b32.xlu1 %v424_v15, %s1852_s1  ;;  %382 = vst.msk [vmem:[#allocation2 + $0x28] sm:$0x3] %vm377_vm3, %v1853_v37  ;;  %v1552_v48 = vld [vmem:[%s2678_s16 + $0x17] ss:$0 sm:$0xff]  ;;  %v1553_v50 = vld [vmem:[%s2678_s16 + $0x15] ss:$0 sm:$0xff] }
  0x76   : > { %433 = vrot.lane.b32.xlu0 %v423_v16, %s1852_s1  ;;  %384 = vst.msk [vmem:[#allocation2 + $0x38] sm:$0x3] %vm377_vm3, %v1853_v37  ;;  %s2681_s18 = sld [smem:[#allocation28_spill]] }
  0x77   : > { %s1376_s9 = sshll.u32 %s2680_s5, 4 }
  0x78   : > { %431 = vrot.lane.b32.xlu2 %v422_v12, %s1852_s1  ;;  %s1213_s11 = sadd.s32 %s2673_s7, %s1376_s9  ;;  %s1203_s7 = scalar_lea.sflag [#allocation5], %s2127_s12 }
  0x79   : > { %s1377_s27 = sshll.u32 %s1213_s11, 3 }
  0x7c   : > { %s2682_s3 = smov %s2681_s18  ;;  %s1215_s21 = scalar_lea.hbm %s2681_s18, %s1377_s27 }
  0x7d   : > { %461 = vrot.lane.b32.xlu1 %v451_v21, %s1852_s1  ;;  %s1218_s26 = sshll.u32 %s1215_s21, 4  ;;  %s1708_s5 = scalar_lea.hbm %s2682_s3, 256  ;;  %s1219_s26 = int_to_ptr.hbm [resolvable:$true] %s1218_s26 }
  0x7e   : > { %459 = vrot.lane.b32.xlu0 %v450_v22, %s1852_s1  ;;  %s1702_s29 = sshra.s32 %s1219_s26, 4  ;;  %s1703_s29 = int_to_ptr.hbm [resolvable:$true] %s1702_s29 }
  0x7f   : > { %s1704_s10 = scalar_lea.hbm %s1703_s29, 64  ;;  %p1709_p10 = scmp.lt.s32.totalorder %s1703_s29, %s2682_s3 }
  0x80   : > { %457 = vrot.lane.b32.xlu2 %v449_v20, %s1852_s1  ;;  %p1705_p12 = scmp.ne.s32.totalorder %s1703_s29, %s1704_s10  ;;  %p1710_p0 = scmp.lt.s32.totalorder %s1708_s5, %s1704_s10 }
  0x82   : > { %p1706_p7 = pnand %p1705_p12, %p2072_p13  ;;  %p1711_p3 = por %p1710_p0, %p1709_p10 }
  0x84   : > { %p1707_p9 = pneg %p1706_p7 }
  0x85   : > { %526 = vperm.xlu1 %1528, %v1530_v25  }
  0x86   : > { %522 = vperm.xlu0 %1527, %v1531_v26   ;;  %p1712_p11 = pnand %p1711_p3, %p1707_p9 }
  0x88   : > { %463 = vrot.lane.b32.xlu2 %v452_v24, %s1852_s1  ;;  %s1855_s1 = smov 126  }
  0x8d   : > { %534 = vperm.xlu1 %1528, %v1533_v28  }
  0x8e   : > { %558 = vperm.xlu0 %1527, %v1534_v29  }
  0x90   : > { %530 = vperm.xlu2 %1529, %v1532_v27  }
  0x95   : > { %562 = vperm.xlu1 %1528, %v1536_v31  }
  0x96   : > { %610 = vperm.xlu0 %1527, %v1537_v32  }
  0x98   : > { %554 = vperm.xlu2 %1529, %v1535_v30  }
  0x9d   : > { %602 = vperm.xlu1 %1528, %v1539_v34  }
  0x9e   : > { %654 = vperm.xlu0 %1527, %v1540_v35  }
  0xa0   : > { %566 = vperm.xlu2 %1529, %v1538_v33  }
  0xa5   : > { %614 = vperm.xlu1 %1528, %v1542_v38  }
  0xa6   : > { %666 = vperm.xlu0 %1527, %v1543_v39  }
  0xa8   : > { %606 = vperm.xlu2 %1529, %v1541_v36  }
  0xad   : > { %658 = vperm.xlu1 %1528, %v1545_v41  }
  0xae   : > { %694 = vperm.xlu0 %1527, %v1546_v42  }
  0xb0   : > { %662 = vperm.xlu2 %1529, %v1544_v40  }
  0xb5   : > { %686 = vperm.xlu1 %1528, %v1548_v44   ;;  %v1554_v44 = vld [vmem:[%s2678_s16 + $0x19] ss:$0 sm:$0xff] }
  0xb6   : > { %734 = vperm.xlu0 %1527, %v1549_v45  }
  0xb8   : > { %690 = vperm.xlu2 %1529, %v1547_v43  }
  0xbd   : > { %698 = vperm.xlu1 %1528, %v1551_v47  }
  0xbe   : > { %746 = vperm.xlu0 %1527, %v1552_v48   ;;  %v1555_v48 = vld [vmem:[%s2678_s16 + $0x1c] ss:$0 sm:$0xff] }
  0xc0   : > { %742 = vperm.xlu2 %1529, %v1550_v46  }
  0xc5   : > { %738 = vperm.xlu1 %1528, %v1553_v50  }
  0xca   : > { %v430_v49 = vpop.permute.xlu2 %429 }
  0xcb   : > { %442 = vst.msk [vmem:[#allocation2] sm:$0x1] %vm441_vm4, %v430_v49 }
  0xd2   : > { %v432_v51 = vpop.permute.xlu2 %431 }
  0xd3   : > { %443 = vst.msk [vmem:[#allocation2 + $0x10] sm:$0x1] %vm441_vm4, %v432_v51 }
  0xd7   : > { %v398_v53 = vpop.permute.xlu1 %397 }
  0xd8   : > { %v394_v54 = vpop.permute.xlu0 %393  ;;  %408 = vst.msk [vmem:[#allocation2 + $0x21] sm:$0xff] %vm405_vm5, %v398_v53 }
  0xd9   : > { %406 = vst.msk [vmem:[#allocation2 + $0x1] sm:$0xff] %vm405_vm5, %v394_v54 }
  0xda   : > { %v458_v52 = vpop.permute.xlu2 %457 }
  0xdb   : > { %469 = vst.msk [vmem:[#allocation2 + $0x9] sm:$0x1] %vm441_vm4, %v458_v52  ;;  %v1556_v52 = vld [vmem:[%s2678_s16 + $0x1f] ss:$0 sm:$0xff] }
  0xdf   : > { %v400_v56 = vpop.permute.xlu1 %399  ;;  %v643_v15 = vld [vmem:[#allocation2 + $0x21] sm:$0xff] }
  0xe0   : > { %v396_v57 = vpop.permute.xlu0 %395  ;;  %409 = vst.msk [vmem:[#allocation2 + $0x31] sm:$0xff] %vm405_vm5, %v400_v56  ;;  %v2287_v4 = vld [vmem:[#allocation2] sm:$0xff] }
  0xe1   : > { %407 = vst.msk [vmem:[#allocation2 + $0x11] sm:$0xff] %vm405_vm5, %v396_v57  ;;  %v641_v24 = vld [vmem:[#allocation2 + $0x1] sm:$0xff]  ;;  %v1558_v57 = vld [vmem:[%s2678_s16 + $0x1d] ss:$0 sm:$0xff] }
  0xe2   : > { %v464_v55 = vpop.permute.xlu2 %463 }
  0xe3   : > { %472 = vst.msk [vmem:[#allocation2 + $0x39] sm:$0x1] %vm441_vm4, %v464_v55  ;;  %v1557_v55 = vld [vmem:[%s2678_s16 + $0x1a] ss:$0 sm:$0xff] }
  0xe7   : > { %v436_v59 = vpop.permute.xlu1 %435  ;;  %v644_v29 = vld [vmem:[#allocation2 + $0x31] sm:$0xff] }
  0xe8   : > { %v434_v60 = vpop.permute.xlu0 %433  ;;  %445 = vst.msk [vmem:[#allocation2 + $0x30] sm:$0x1] %vm441_vm4, %v436_v59  ;;  %v510_v3 = vld [vmem:[#allocation2 + $0x10] sm:$0xff]  ;;  %v1559_v59 = vld [vmem:[%s2678_s16 + $0x18] ss:$0 sm:$0xff] }
  0xe9   : > { %444 = vst.msk [vmem:[#allocation2 + $0x20] sm:$0x1] %vm441_vm4, %v434_v60  ;;  %v642_v20 = vld [vmem:[#allocation2 + $0x11] sm:$0xff]  ;;  %v1560_v60 = vld [vmem:[%s2678_s16 + $0x1b] ss:$0 sm:$0xff] }
  0xea   : > { %v531_v58 = vpop.permute.xlu2 %530 }
  0xef   : > { %v462_v62 = vpop.permute.xlu1 %461  ;;  %v2294_v10 = vld [vmem:[#allocation2 + $0x30] sm:$0xff] }
  0xf0   : > { %v460_v63 = vpop.permute.xlu0 %459  ;;  %471 = vst.msk [vmem:[#allocation2 + $0x29] sm:$0x1] %vm441_vm4, %v462_v62  ;;  %v2281_v1 = vld [vmem:[#allocation2 + $0x20] sm:$0xff] }
  0xf1   : > { %470 = vst.msk [vmem:[#allocation2 + $0x19] sm:$0x1] %vm441_vm4, %v460_v63  ;;  %v2285_v2 = vmul.f32 %v531_v58, %v2281_v1 }
  0xf2   : > { %v555_v61 = vpop.permute.xlu2 %554 }
  0xf3   : > { %v569_v26 = vmul.f32 %v555_v61, %v2287_v4  ;;  %v1561_v61 = vld [vmem:[%s2678_s16 + $0x1e] ss:$0 sm:$0xff] }
  0xf7   : > { %v527_v5 = vpop.permute.xlu1 %526 }
  0xf8   : > { %v523_v6 = vpop.permute.xlu0 %522  ;;  %v2289_v7 = vmul.f32 %v527_v5, %v510_v3 }
  0xf9   : > { %v2292_v8 = vmul.f32 %v523_v6, %v2287_v4 }
  0xfa   : > { %v567_v0 = vpop.permute.xlu2 %566 }
  0xfb   : > { %v572_v31 = vmul.f32 %v567_v0, %v2294_v10 }
  0xff   : > { %v535_v11 = vpop.permute.xlu1 %534 }
 0x100   : > { %v559_v12 = vpop.permute.xlu0 %558  ;;  %v2297_v13 = vmul.f32 %v535_v11, %v2294_v10 }
 0x101   : > { %v570_v45 = vmul.f32 %v559_v12, %v510_v3 }
 0x102   : > { %v607_v9 = vpop.permute.xlu2 %606 }
 0x103   : > { %v618_v36 = vmul.f32 %v607_v9, %v510_v3 }
 0x107   : > { %v563_v17 = vpop.permute.xlu1 %562 }
 0x108   : > { %v611_v18 = vpop.permute.xlu0 %610  ;;  %v571_v53 = vmul.f32 %v563_v17, %v2281_v1 }
 0x109   : > { %v619_v49 = vmul.f32 %v611_v18, %v2281_v1 }
 0x10a   : > { %v663_v14 = vpop.permute.xlu2 %662 }
 0x10b   : > { %v2299_v16 = vmul.f32 %v663_v14, %v643_v15 }
 0x10f   : > { %v603_v22 = vpop.permute.xlu1 %602 }
 0x110   : > { %v655_v23 = vpop.permute.xlu0 %654  ;;  %v617_v56 = vmul.f32 %v603_v22, %v2287_v4 }
 0x111   : > { %v2302_v25 = vmul.f32 %v655_v23, %v641_v24 }
 0x112   : > { %v691_v19 = vpop.permute.xlu2 %690 }
 0x113   : > { %v702_v21 = vmul.f32 %v691_v19, %v642_v20 }
 0x115   : > { %711 = vrot.lane.b32.xlu0 %v702_v21, %s1854_s14 }
 0x117   : > { %v615_v27 = vpop.permute.xlu1 %614 }
 0x118   : > { %v667_v28 = vpop.permute.xlu0 %666  ;;  %v620_v58 = vmul.f32 %v615_v27, %v2294_v10  ;;  %v2359_v27 = vld [vmem:[#allocation2 + $0x12] sm:$0xff] }
 0x119   : > { %v2306_v30 = vmul.f32 %v667_v28, %v644_v29 }
 0x11a   : > { %v743_v37 = vpop.permute.xlu2 %742 }
 0x11b   : > { %v751_v42 = vmul.f32 %v743_v37, %v643_v15 }
 0x11d   : > { %577 = vrot.lane.b32.xlu0 %v569_v26, %s1854_s14 }
 0x11f   : > { %v659_v32 = vpop.permute.xlu1 %658 }
 0x120   : > { %v695_v33 = vpop.permute.xlu0 %694  ;;  %v2310_v34 = vmul.f32 %v659_v32, %v642_v20 }
 0x121   : > { %v703_v35 = vmul.f32 %v695_v33, %v643_v15  ;;  %v773_v33 = vld [vmem:[#allocation2 + $0x2] sm:$0xff] }
 0x123   : > { %713 = vrot.lane.b32.xlu1 %v703_v35, %s1854_s14 }
 0x125   : > { %583 = vrot.lane.b32.xlu0 %v572_v31, %s1854_s14 }
 0x127   : > { %v687_v38 = vpop.permute.xlu1 %686 }
 0x128   : > { %v735_v39 = vpop.permute.xlu0 %734  ;;  %v701_v40 = vmul.f32 %v687_v38, %v641_v24 }
 0x129   : > { %v749_v41 = vmul.f32 %v735_v39, %v641_v24 }
 0x12a   : > { %709 = vrot.lane.b32.xlu2 %v701_v40, %s1854_s14 }
 0x12b   : > { %757 = vrot.lane.b32.xlu1 %v749_v41, %s1855_s1 }
 0x12d   : > { %627 = vrot.lane.b32.xlu0 %v618_v36, %s1855_s1 }
 0x12f   : > { %v699_v43 = vpop.permute.xlu1 %698 }
 0x130   : > { %v704_v46 = vmul.f32 %v699_v43, %v644_v29  ;;  %v747_v51 = vpop.permute.xlu0 %746 }
 0x131   : > { %v752_v54 = vmul.f32 %v747_v51, %v644_v29 }
 0x132   : > { %715 = vrot.lane.b32.xlu2 %v704_v46, %s1854_s14 }
 0x133   : > { %579 = vrot.lane.b32.xlu1 %v570_v45, %s1854_s14  ;;  %v776_v45 = vld [vmem:[#allocation2 + $0x32] sm:$0xff] }
 0x135   : > { %761 = vrot.lane.b32.xlu0 %v751_v42, %s1855_s1 }
 0x137   : > { %v739_v47 = vpop.permute.xlu1 %738 }
 0x138   : > { %v750_v50 = vmul.f32 %v739_v47, %v642_v20 }
 0x13a   : > { %759 = vrot.lane.b32.xlu2 %v750_v50, %s1855_s1 }
 0x13b   : > { %629 = vrot.lane.b32.xlu1 %v619_v49, %s1855_s1  ;;  %v775_v49 = vld [vmem:[#allocation2 + $0x22] sm:$0xff] }
 0x13d   : > { %790 = vperm.xlu0 %1527, %v1554_v44  }
 0x142   : > { %581 = vrot.lane.b32.xlu2 %v571_v53, %s1854_s14 }
 0x143   : > { %763 = vrot.lane.b32.xlu1 %v752_v54, %s1855_s1 }
 0x145   : > { %818 = vperm.xlu0 %1527, %v1555_v48  }
 0x14a   : > { %625 = vrot.lane.b32.xlu2 %v617_v56, %s1855_s1 }
 0x14b   : > { %794 = vperm.xlu1 %1528, %v1557_v55  }
 0x14d   : > { %830 = vperm.xlu0 %1527, %v1556_v52  }
 0x152   : > { %631 = vrot.lane.b32.xlu2 %v620_v58, %s1855_s1 }
 0x153   : > { %822 = vperm.xlu1 %1528, %v1558_v57  }
 0x15a   : > { %786 = vperm.xlu2 %1529, %v1559_v59   ;;  %v1563_v59 = vld [vmem:[%s2678_s16 + $0x20] ss:$0 sm:$0xff] }
 0x162   : > { %798 = vperm.xlu2 %1529, %v1560_v60   ;;  %v1564_v60 = vld [vmem:[%s2678_s16 + $0x21] ss:$0 sm:$0xff] }
 0x16a   : > { %826 = vperm.xlu2 %1529, %v1561_v61   ;;  %v1565_v61 = vld [vmem:[%s2678_s16 + $0x23] ss:$0 sm:$0xff] }
 0x184   : > { %v710_v63 = vpop.permute.xlu2 %709 }
 0x187   : > { %v712_v62 = vpop.permute.xlu0 %711 }
 0x18c   : > { %v716_v3 = vpop.permute.xlu2 %715 }
 0x18f   : > { %v578_v0 = vpop.permute.xlu0 %577 }
 0x190   : > { %v589_v1 = vadd.f32 %v578_v0, %v2292_v8 }
 0x194   : > { %v760_v9 = vpop.permute.xlu2 %759 }
 0x195   : > { %v714_v6 = vpop.permute.xlu1 %713 }
 0x197   : > { %v584_v4 = vpop.permute.xlu0 %583 }
 0x198   : > { %v592_v5 = vadd.f32 %v584_v4, %v2297_v13 }
 0x19c   : > { %v582_v12 = vpop.permute.xlu2 %581 }
 0x19d   : > { %v758_v11 = vpop.permute.xlu1 %757  ;;  %v591_v14 = vadd.f32 %v582_v12, %v2285_v2 }
 0x19f   : > { %v628_v10 = vpop.permute.xlu0 %627 }
 0x1a4   : > { %v626_v18 = vpop.permute.xlu2 %625 }
 0x1a5   : > { %v580_v17 = vpop.permute.xlu1 %579  ;;  %v637_v20 = vadd.f32 %v626_v18, %v589_v1 }
 0x1a6   : > { %v590_v19 = vadd.f32 %v580_v17, %v2289_v7  ;;  %v1567_v17 = vld [vmem:[%s2679_s15 + $0x1] ss:$0 sm:$0xff] }
 0x1a7   : > { %v762_v15 = vpop.permute.xlu0 %761  ;;  %v673_v8 = vadd.f32 %v2302_v25, %v637_v20 }
 0x1a8   : > { %v638_v22 = vadd.f32 %v628_v10, %v590_v19  ;;  %v1568_v19 = vld [vmem:[%s2679_s15 + $0x5] ss:$0 sm:$0xff] }
 0x1a9   : > { %v721_v13 = vadd.f32 %v710_v63, %v673_v8  ;;  %v1570_v8 = vld [vmem:[%s2679_s15 + $0x8] ss:$0 sm:$0xff] }
 0x1aa   : > { %v674_v23 = vadd.f32 %v2310_v34, %v638_v22 }
 0x1ab   : > { %v769_v26 = vadd.f32 %v758_v11, %v721_v13  ;;  %v1572_v13 = vld [vmem:[%s2679_s15 + $0x7] ss:$0 sm:$0xff] }
 0x1ac   : > { %v722_v24 = vadd.f32 %v712_v62, %v674_v23  ;;  %v632_v29 = vpop.permute.xlu2 %631  ;;  %v1571_v23 = vld [vmem:[%s2679_s15] ss:$0 sm:$0xff] }
 0x1ad   : > { %v630_v28 = vpop.permute.xlu1 %629  ;;  %v640_v32 = vadd.f32 %v632_v29, %v592_v5  ;;  %v1577_v29 = vld [vmem:[%s2679_s15 + $0x6] ss:$0 sm:$0xff] }
 0x1ae   : > { %v639_v31 = vadd.f32 %v630_v28, %v591_v14  ;;  %v770_v35 = vadd.f32 %v760_v9, %v722_v24  ;;  %v1566_v14 = vld [vmem:[%s2679_s15 + $0x2] ss:$0 sm:$0xff]  ;;  %v1573_v24 = vld [vmem:[%s2679_s15 + $0xb] ss:$0 sm:$0xff]  ;;  %v1576_v28 = vld [vmem:[%s2679_s15 + $0xe] ss:$0 sm:$0xff] }
 0x1af   : > { %v791_v21 = vpop.permute.xlu0 %790  ;;  %v676_v25 = vadd.f32 %v2306_v30, %v640_v32  ;;  %v1562_v30 = vld [vmem:[%s2678_s16 + $0x22] ss:$0 sm:$0xff]  ;;  %v1580_v32 = vld [vmem:[%s2679_s15 + $0x9] ss:$0 sm:$0xff] }
 0x1b0   : > { %v802_v2 = vmul.f32 %v791_v21, %v2359_v27  ;;  %v675_v37 = vadd.f32 %v2299_v16, %v639_v31  ;;  %v1569_v21 = vld [vmem:[%s2679_s15 + $0x4] ss:$0 sm:$0xff]  ;;  %v1579_v31 = vld [vmem:[%s2679_s15 + $0x11] ss:$0 sm:$0xff] }
 0x1b1   : > { %v724_v39 = vadd.f32 %v716_v3, %v676_v25  ;;  %v1586_v25 = vld [vmem:[%s2679_s15 + $0xf] ss:$0 sm:$0xff] }
 0x1b2   : > { %v806_v34 = vadd.f32 %v802_v2, %v770_v35  ;;  %v723_v38 = vadd.f32 %v714_v6, %v675_v37  ;;  %v1578_v2 = vld [vmem:[%s2679_s15 + $0xd] ss:$0 sm:$0xff]  ;;  %v1583_v35 = vld [vmem:[%s2679_s15 + $0xc] ss:$0 sm:$0xff]  ;;  %v1585_v37 = vld [vmem:[%s2679_s15 + $0x17] ss:$0 sm:$0xff] }
 0x1b4   : > { %v771_v40 = vadd.f32 %v762_v15, %v723_v38  ;;  %v787_v42 = vpop.permute.xlu2 %786  ;;  %v1588_v38 = vld [vmem:[%s2679_s15 + $0x1a] ss:$0 sm:$0xff] }
 0x1b5   : > { %v764_v41 = vpop.permute.xlu1 %763  ;;  %v801_v44 = vmul.f32 %v787_v42, %v773_v33  ;;  %v1592_v42 = vld [vmem:[%s2679_s15 + $0x15] ss:$0 sm:$0xff] }
 0x1b6   : > { %v772_v43 = vadd.f32 %v764_v41, %v724_v39  ;;  %v1589_v39 = vld [vmem:[%s2679_s15 + $0x12] ss:$0 sm:$0xff]  ;;  %v1591_v41 = vld [vmem:[%s2679_s15 + $0x1d] ss:$0 sm:$0xff] }
 0x1b7   : > { %v819_v7 = vpop.permute.xlu0 %818  ;;  %v805_v48 = vadd.f32 %v801_v44, %v769_v26  ;;  %v1574_v26 = vld [vmem:[%s2679_s15 + $0x3] ss:$0 sm:$0xff]  ;;  %v1594_v44 = vld [vmem:[%s2679_s15 + $0x18] ss:$0 sm:$0xff] }
 0x1b8   : > { %v833_v36 = vmul.f32 %v819_v7, %v773_v33  ;;  %v1582_v7 = vld [vmem:[%s2679_s15 + $0x14] ss:$0 sm:$0xff] }
 0x1ba   : > { %841 = vrot.lane.b32.xlu1 %v833_v36, %s1854_s14  ;;  %v1584_v36 = vld [vmem:[%s2679_s15 + $0x13] ss:$0 sm:$0xff] }
 0x1bc   : > { %v799_v50 = vpop.permute.xlu2 %798 }
 0x1bd   : > { %v795_v16 = vpop.permute.xlu1 %794  ;;  %v804_v52 = vmul.f32 %v799_v50, %v776_v45 }
 0x1be   : > { %v803_v51 = vmul.f32 %v795_v16, %v775_v49  ;;  %v1597_v16 = vld [vmem:[%s2679_s15 + $0x1e] ss:$0 sm:$0xff] }
 0x1bf   : > { %v831_v46 = vpop.permute.xlu0 %830  ;;  %v808_v53 = vadd.f32 %v804_v52, %v772_v43  ;;  %v1593_v43 = vld [vmem:[%s2679_s15 + $0x1c] ss:$0 sm:$0xff] }
 0x1c0   : > { %v836_v47 = vmul.f32 %v831_v46, %v776_v45  ;;  %v807_v54 = vadd.f32 %v803_v51, %v771_v40  ;;  %v1590_v40 = vld [vmem:[%s2679_s15 + $0x19] ss:$0 sm:$0xff] }
 0x1c2   : > { %847 = vrot.lane.b32.xlu1 %v836_v47, %s1854_s14 }
 0x1c4   : > { %v827_v56 = vpop.permute.xlu2 %826 }
 0x1c5   : > { %v823_v55 = vpop.permute.xlu1 %822  ;;  %v835_v58 = vmul.f32 %v827_v56, %v775_v49 }
 0x1c6   : > { %v834_v57 = vmul.f32 %v823_v55, %v2359_v27 }
 0x1c7   : > { %845 = vrot.lane.b32.xlu0 %v835_v58, %s1854_s14 }
 0x1c8   : > { %843 = vrot.lane.b32.xlu2 %v834_v57, %s1854_s14 }
 0x1ca   : > { %874 = vperm.xlu1 %1528, %v1562_v30  }
 0x1cf   : > { %870 = vperm.xlu0 %1527, %v1564_v60  }
 0x1d0   : > { %866 = vperm.xlu2 %1529, %v1563_v59  }
 0x1d8   : > { %878 = vperm.xlu2 %1529, %v1565_v61  }
 0x222   : > { %v844_v62 = vpop.permute.xlu2 %843 }
 0x223   : > { %v2381_v63 = vadd.f32 %v844_v62, %v806_v34  ;;  %v1587_v34 = vld [vmem:[%s2679_s15 + $0x16] ss:$0 sm:$0xff] }
 0x22a   : > { %v867_v3 = vpop.permute.xlu2 %866 }
 0x22b   : > { %v881_v4 = vmul.f32 %v867_v3, %v773_v33  ;;  %v1581_v33 = vld [vmem:[%s2679_s15 + $0x10] ss:$0 sm:$0xff] }
 0x22c   : > { %v842_v0 = vpop.permute.xlu1 %841 }
 0x22d   : > { %v2383_v1 = vadd.f32 %v842_v0, %v805_v48  ;;  %889 = vrot.lane.b32.xlu0 %v881_v4, %s1855_s1  ;;  %v1596_v48 = vld [vmem:[%s2679_s15 + $0x1b] ss:$0 sm:$0xff] }
 0x232   : > { %v879_v9 = vpop.permute.xlu2 %878 }
 0x233   : > { %v884_v10 = vmul.f32 %v879_v9, %v776_v45  ;;  %v1595_v45 = vld [vmem:[%s2679_s15 + $0x1f] ss:$0 sm:$0xff] }
 0x234   : > { %v848_v5 = vpop.permute.xlu1 %847 }
 0x235   : > { %v2385_v6 = vadd.f32 %v848_v5, %v808_v53  ;;  %895 = vrot.lane.b32.xlu0 %v884_v10, %s1855_s1 }
 0x239   : > { %v846_v15 = vpop.permute.xlu0 %845 }
 0x23a   : > { %v2396_v18 = vadd.f32 %v846_v15, %v807_v54 }
 0x23c   : > { %v875_v11 = vpop.permute.xlu1 %874 }
 0x23d   : > { %v883_v12 = vmul.f32 %v875_v11, %v775_v49  ;;  %962 = vperm.xlu0 %1527, %v1566_v14  }
 0x23f   : > { %893 = vrot.lane.b32.xlu2 %v883_v12, %s1855_s1 }
 0x241   : > { %v871_v20 = vpop.permute.xlu0 %870 }
 0x242   : > { %v882_v22 = vmul.f32 %v871_v20, %v2359_v27  ;;  %v1575_v27 = vld [vmem:[%s2679_s15 + $0xa] ss:$0 sm:$0xff] }
 0x244   : > { %891 = vrot.lane.b32.xlu1 %v882_v22, %s1855_s1  ;;  %s1374_s1 = sshll.u32 %s2127_s12, 6 }
 0x245   : > { %974 = vperm.xlu0 %1527, %v1568_v19   ;;  %s2513_s28 = scalar_lea.vmem [#allocation9], %s1374_s1 }
 0x246   : > { %s1216_s8 = sshll.u32 %s2513_s28, 4  ;;  %s1217_s8 = int_to_ptr.vmem [resolvable:$true] %s1216_s8 }
 0x247   : > { %958 = vperm.xlu2 %1529, %v1567_v17  }
 0x24c   : > { %954 = vperm.xlu1 %1528, %v1571_v23  }
 0x24d   : > { %1018 = vperm.xlu0 %1527, %v1570_v8  }
 0x24f   : > { %970 = vperm.xlu2 %1529, %v1569_v21  }
 0x254   : > { %966 = vperm.xlu1 %1528, %v1574_v26  }
 0x255   : > { %1030 = vperm.xlu0 %1527, %v1573_v24  }
 0x257   : > { %982 = vperm.xlu2 %1529, %v1572_v13  }
 0x25c   : > { %978 = vperm.xlu1 %1528, %v1577_v29  }
 0x25d   : > { %1042 = vperm.xlu0 %1527, %v1576_v28  }
 0x25f   : > { %1026 = vperm.xlu2 %1529, %v1575_v27  }
 0x264   : > { %1022 = vperm.xlu1 %1528, %v1580_v32  }
 0x265   : > { %1086 = vperm.xlu0 %1527, %v1579_v31  }
 0x267   : > { %1038 = vperm.xlu2 %1529, %v1578_v2  }
 0x26c   : > { %1034 = vperm.xlu1 %1528, %v1583_v35  }
 0x26d   : > { %1098 = vperm.xlu0 %1527, %v1582_v7  }
 0x26f   : > { %1082 = vperm.xlu2 %1529, %v1581_v33  }
 0x274   : > { %1046 = vperm.xlu1 %1528, %v1586_v25  }
 0x275   : > { %1110 = vperm.xlu0 %1527, %v1585_v37  }
 0x277   : > { %1094 = vperm.xlu2 %1529, %v1584_v36  }
 0x27c   : > { %1090 = vperm.xlu1 %1528, %v1589_v39  }
 0x27d   : > { %1154 = vperm.xlu0 %1527, %v1588_v38  }
 0x27f   : > { %1106 = vperm.xlu2 %1529, %v1587_v34  }
 0x284   : > { %1102 = vperm.xlu1 %1528, %v1592_v42  }
 0x285   : > { %1166 = vperm.xlu0 %1527, %v1591_v41  }
 0x287   : > { %1150 = vperm.xlu2 %1529, %v1590_v40  }
 0x28c   : > { %1146 = vperm.xlu1 %1528, %v1594_v44  }
 0x28f   : > { %1162 = vperm.xlu2 %1529, %v1593_v43  }
 0x294   : > { %1158 = vperm.xlu1 %1528, %v1596_v48  }
 0x297   : > { %1174 = vperm.xlu2 %1529, %v1595_v45  }
 0x299   : > { %v894_v46 = vpop.permute.xlu2 %893 }
 0x29a   : > { %v2485_v47 = vadd.f32 %v894_v46, %v2396_v18 }
 0x29c   : > { %1170 = vperm.xlu1 %1528, %v1597_v16  }
 0x29f   : > { %v890_v50 = vpop.permute.xlu0 %889 }
 0x2a0   : > { %v901_v57 = vadd.f32 %v890_v50, %v2383_v1 }
 0x2a1   : > { %v959_v49 = vpop.permute.xlu2 %958 }
 0x2a2   : > { %v986_v33 = vmul.f32 %v959_v49, %v901_v57 }
 0x2a7   : > { %v896_v51 = vpop.permute.xlu0 %895 }
 0x2a8   : > { %v904_v36 = vadd.f32 %v896_v51, %v2385_v6 }
 0x2a9   : > { %v971_v30 = vpop.permute.xlu2 %970 }
 0x2aa   : > { %v989_v42 = vmul.f32 %v971_v30, %v901_v57 }
 0x2af   : > { %v963_v53 = vpop.permute.xlu0 %962 }
 0x2b0   : > { %v987_v60 = vmul.f32 %v963_v53, %v901_v57 }
 0x2b1   : > { %v2493_v52 = vpop.permute.xlu2 %982 }
 0x2b2   : > { %v992_v51 = vmul.f32 %v2493_v52, %v901_v57 }
 0x2b6   : > { %v892_v55 = vpop.permute.xlu1 %891 }
 0x2b7   : > { %v975_v56 = vpop.permute.xlu0 %974  ;;  %v902_v58 = vadd.f32 %v892_v55, %v2381_v63 }
 0x2b8   : > { %v990_v61 = vmul.f32 %v975_v56, %v901_v57 }
 0x2b9   : > { %v1027_v54 = vpop.permute.xlu2 %1026 }
 0x2ba   : > { %v1051_v0 = vmul.f32 %v1027_v54, %v902_v58 }
 0x2bc   : > { %v2499_v4 = vadd.f32 %v1051_v0, %v987_v60 }
 0x2be   : > { %v955_v5 = vpop.permute.xlu1 %954 }
 0x2bf   : > { %v1019_v9 = vpop.permute.xlu0 %1018  ;;  %v985_v10 = vmul.f32 %v955_v5, %v901_v57 }
 0x2c0   : > { %v1049_v11 = vmul.f32 %v1019_v9, %v902_v58 }
 0x2c1   : > { %v1039_v59 = vpop.permute.xlu2 %1038 }
 0x2c2   : > { %v1054_v62 = vmul.f32 %v1039_v59, %v902_v58  ;;  %v1057_v15 = vadd.f32 %v1049_v11, %v985_v10 }
 0x2c4   : > { %v2497_v3 = vadd.f32 %v1054_v62, %v990_v61 }
 0x2c6   : > { %v967_v63 = vpop.permute.xlu1 %966 }
 0x2c7   : > { %v1031_v17 = vpop.permute.xlu0 %1030  ;;  %v988_v18 = vmul.f32 %v967_v63, %v901_v57 }
 0x2c8   : > { %v1052_v19 = vmul.f32 %v1031_v17, %v902_v58 }
 0x2c9   : > { %v1083_v12 = vpop.permute.xlu2 %1082 }
 0x2ca   : > { %v1113_v14 = vmul.f32 %v1083_v12, %v2485_v47  ;;  %v1060_v22 = vadd.f32 %v1052_v19, %v988_v18 }
 0x2cc   : > { %v2502_v1 = vadd.f32 %v1113_v14, %v1057_v15 }
 0x2ce   : > { %v979_v23 = vpop.permute.xlu1 %978 }
 0x2cf   : > { %v1043_v13 = vpop.permute.xlu0 %1042  ;;  %v991_v24 = vmul.f32 %v979_v23, %v901_v57 }
 0x2d0   : > { %v1055_v26 = vmul.f32 %v1043_v13, %v902_v58 }
 0x2d1   : > { %v1095_v20 = vpop.permute.xlu2 %1094 }
 0x2d2   : > { %v1116_v21 = vmul.f32 %v1095_v20, %v2485_v47  ;;  %v1063_v29 = vadd.f32 %v1055_v26, %v991_v24 }
 0x2d4   : > { %v2505_v8 = vadd.f32 %v1116_v21, %v1060_v22 }
 0x2d6   : > { %v1023_v31 = vpop.permute.xlu1 %1022 }
 0x2d7   : > { %v1087_v32 = vpop.permute.xlu0 %1086  ;;  %v1050_v7 = vmul.f32 %v1023_v31, %v902_v58 }
 0x2d8   : > { %v1114_v25 = vmul.f32 %v1087_v32, %v2485_v47 }
 0x2d9   : > { %v1107_v27 = vpop.permute.xlu2 %1106  ;;  %v1058_v37 = vadd.f32 %v1050_v7, %v986_v33 }
 0x2da   : > { %v1119_v28 = vmul.f32 %v1107_v27, %v2485_v47 }
 0x2db   : > { %v1122_v34 = vadd.f32 %v1114_v25, %v1058_v37 }
 0x2dc   : > { %v2508_v2 = vadd.f32 %v1119_v28, %v1063_v29 }
 0x2de   : > { %v1035_v40 = vpop.permute.xlu1 %1034 }
 0x2df   : > { %v1099_v41 = vpop.permute.xlu0 %1098  ;;  %v1053_v43 = vmul.f32 %v1035_v40, %v902_v58 }
 0x2e0   : > { %v1117_v45 = vmul.f32 %v1099_v41, %v2485_v47 }
 0x2e1   : > { %v1151_v35 = vpop.permute.xlu2 %1150  ;;  %v1061_v6 = vadd.f32 %v1053_v43, %v989_v42 }
 0x2e2   : > { %v1178_v38 = vmul.f32 %v1151_v35, %v904_v36 }
 0x2e3   : > { %v1125_v46 = vadd.f32 %v1117_v45, %v1061_v6 }
 0x2e4   : > { %v1186_v39 = vadd.f32 %v1178_v38, %v1122_v34 }
 0x2e6   : > { %1195 = vst.msk [vmem:[%s2513_s28 + $0x8] sm:$0xff] %vm1193_vm6, %v1186_v39  ;;  %v1047_v16 = vpop.permute.xlu1 %1046 }
 0x2e7   : > { %v1111_v50 = vpop.permute.xlu0 %1110  ;;  %v1056_v30 = vmul.f32 %v1047_v16, %v902_v58 }
 0x2e8   : > { %v1120_v55 = vmul.f32 %v1111_v50, %v2485_v47 }
 0x2e9   : > { %v1163_v44 = vpop.permute.xlu2 %1162  ;;  %v1064_v54 = vadd.f32 %v1056_v30, %v992_v51 }
 0x2ea   : > { %v1181_v48 = vmul.f32 %v1163_v44, %v904_v36 }
 0x2eb   : > { %v1128_v56 = vadd.f32 %v1120_v55, %v1064_v54 }
 0x2ec   : > { %v1189_v49 = vadd.f32 %v1181_v48, %v1125_v46 }
 0x2ee   : > { %1198 = vst.msk [vmem:[%s2513_s28 + $0x20] sm:$0xff] %vm1193_vm6, %v1189_v49  ;;  %v1091_v61 = vpop.permute.xlu1 %1090 }
 0x2ef   : > { %v1155_v62 = vpop.permute.xlu0 %1154  ;;  %v1115_v0 = vmul.f32 %v1091_v61, %v2485_v47 }
 0x2f0   : > { %v1179_v57 = vmul.f32 %v1155_v62, %v904_v36 }
 0x2f1   : > { %v1175_v53 = vpop.permute.xlu2 %1174  ;;  %v1123_v52 = vadd.f32 %v1115_v0, %v2499_v4 }
 0x2f2   : > { %v1184_v59 = vmul.f32 %v1175_v53, %v904_v36 }
 0x2f3   : > { %v1187_v58 = vadd.f32 %v1179_v57, %v1123_v52 }
 0x2f4   : > { %v1192_v60 = vadd.f32 %v1184_v59, %v1128_v56 }
 0x2f5   : > { %1196 = vst.msk [vmem:[%s2513_s28 + $0x10] sm:$0xff] %vm1193_vm6, %v1187_v58 }
 0x2f6   : > { %1201 = vst.msk [vmem:[%s2513_s28 + $0x38] sm:$0xff] %vm1193_vm6, %v1192_v60  ;;  %v1103_v5 = vpop.permute.xlu1 %1102 }
 0x2f7   : > { %v1167_v9 = vpop.permute.xlu0 %1166  ;;  %v1118_v10 = vmul.f32 %v1103_v5, %v2485_v47 }
 0x2f8   : > { %v1182_v12 = vmul.f32 %v1167_v9, %v904_v36 }
 0x2f9   : > { %v1126_v11 = vadd.f32 %v1118_v10, %v2497_v3 }
 0x2fb   : > { %v1190_v14 = vadd.f32 %v1182_v12, %v1126_v11 }
 0x2fd   : > { %1199 = vst.msk [vmem:[%s2513_s28 + $0x28] sm:$0xff] %vm1193_vm6, %v1190_v14 }
 0x2fe   : > { %v1147_v15 = vpop.permute.xlu1 %1146 }
 0x2ff   : > { %v1177_v63 = vmul.f32 %v1147_v15, %v904_v36 }
 0x301   : > { %v1185_v4 = vadd.f32 %v1177_v63, %v2502_v1 }
 0x303   : > { %1194 = vst.msk [vmem:[%s2513_s28] sm:$0xff] %vm1193_vm6, %v1185_v4 }
 0x306   : > { %v1159_v17 = vpop.permute.xlu1 %1158 }
 0x307   : > { %v1180_v47 = vmul.f32 %v1159_v17, %v904_v36 }
 0x309   : > { %v1188_v3 = vadd.f32 %v1180_v47, %v2505_v8 }
 0x30b   : > { %1197 = vst.msk [vmem:[%s2513_s28 + $0x18] sm:$0xff] %vm1193_vm6, %v1188_v3 }
 0x30e   : > { %v1171_v1 = vpop.permute.xlu1 %1170 }
 0x30f   : > { %v1183_v18 = vmul.f32 %v1171_v1, %v904_v36 }
 0x311   : > { %v1191_v19 = vadd.f32 %v1183_v18, %v2508_v2 }
 0x313   : > { %1200 = vst.msk [vmem:[%s2513_s28 + $0x30] sm:$0xff] %vm1193_vm6, %v1191_v19 }
 0x314   : > { %1715 = shalt.err (!%p1712_p11)
}
 0x315   : > { %s1856_s12 = smov 128   ;;  %s1857_s28 = smov 256  }
 0x316   : > { %s1858_s27 = smov 8  }
 0x317   : > { %1386 = dma.vmem_to_hbm [thread:$0]  (%p2072_p13), %s1217_s8, 1024, %s1219_s26, %s1203_s7, %s1856_s12, %s1857_s28, %s1858_s27  }
 0x318 PF: > { %p1403_p4 = scmp.ge.s32.totalorder %s1846_s6, 2  ;;  %s1233_s17 = sand.u32 1, %s1818_s24  }
 0x319   : > { %s1234_s18 = scalar_lea.sflag [#allocation5], %s1233_s17 }
 0x31a   : > { %p1399_p1 = pnand %p1403_p4, %p2076_p5 }
 0x31c   : > { %p1400_p6 = pneg %p1399_p1 }
 0x31e   : > { %1785 = dma.done.wait (%p1400_p6), %s1234_s18, 1024  }
 0x31f   : > { %1787 = vsyncadd (%p1400_p6), %s1234_s18, 4294966272  ;;  %s24_s6 = sadd.s32 1, %s1846_s6   ;;  %s2685_s13 = sld [smem:[#allocation14_spill]] }
 0x320   : > { %p2563_p2 = scmp.ge.s32.totalorder %s24_s6, 6   ;;  %s2686_s23 = sld [smem:[#allocation22_spill]] }
 0x321   : > { %s2687_s8 = sld [smem:[#allocation15_spill]]  ;;  %s2693_s18 = smov %s1798_s19 }
 0x322   : > { %s2688_s26 = sld [smem:[#allocation23_spill]]  ;;  %s2694_s19 = smov %s1802_s20 }
 0x323   : > { %s2689_s27 = sld [smem:[#allocation18_spill]]  ;;  %s2695_s20 = smov %s2113_s4 }
 0x324   : > { %s2690_s29 = sld [smem:[#allocation19_spill]]  ;;  %s2696_s21 = smov %s1810_s22 }
 0x325   : > { %s2691_s7 = sld [smem:[#allocation20_spill]]  ;;  %s2697_s22 = smov %s2685_s13 }
 0x326   : > { %s2698_s24 = smov %s1822_s25  ;;  %s2700_s28 = smov %s1842_s30 }
 0x327   : > { %s2699_s25 = smov %s2687_s8  ;;  %23 = sbr.rel (!%p2563_p2) target bundleno = 17 (0x11), region = 109 }
 0x32b   : > { %s2701_s30 = smov %s2691_s7 }
 0x32c   :  { %1240 = vsyncpa [#allocation4], 1 }
 0x32d   :  { %1242 = vsyncpa [#allocation4 + $0x1], 1 }
 0x32e   :  { %1243 = vsyncpa [#allocation7], 1 }
 0x32f   :  { %1245 = vsyncpa [#allocation7 + $0x1], 1 }
 0x330   :  { %1246 = vsyncpa [#allocation5], 1 }
 0x331   :  { %1248 = vsyncpa [#allocation5 + $0x1], 1 }

</bundles_post_ra>
